<compile_context>
chip_gen: v5e
topology: v5e:2x2
jax: 0.10.0
libtpu: 0.0.40
codegen_flags: <defaults>
</compile_context>

<pallas_src>
from functools import partial

import jax
import jax.numpy as jnp
from jax.experimental import pallas as pl
from jax.experimental.pallas import tpu as pltpu

A_PAD = 128  # lane-dense padded action dimension


def _linear_kernel(x_ref, w_ref, b_ref, o_ref):
    # (bm, S) @ (S, A_PAD) on the MXU, f32 accumulate, + broadcast bias.
    o_ref[...] = (
        jnp.dot(x_ref[...], w_ref[...], preferred_element_type=jnp.float32)
        + b_ref[...]
    ).astype(o_ref.dtype)


def prepare_policy_params(weight, bias):
    """One-time parameter prep (do NOT call per forward step).

    weight: (A, S) f32 in PyTorch nn.Linear layout; bias: (A,) f32.
    Returns (w_pad, b_pad): (S, A_PAD) and (1, A_PAD), zero-padded so the
    padded logit columns are exactly 0 + 0 and can be sliced away.
    """
    A, S = weight.shape
    w_pad = jnp.zeros((S, A_PAD), jnp.float32).at[:, :A].set(
        weight.T.astype(jnp.float32))
    b_pad = jnp.zeros((1, A_PAD), jnp.float32).at[:, :A].set(
        bias.astype(jnp.float32))
    return w_pad, b_pad


def _pick_batch_block(B):
    """Batch block: large (amortize per-step overhead), multiple of 8, and
    capped at ceil(B/2) so the grid has >= 2 steps (v7x dual-TC split)."""
    half = -(-B // 2)            # ceil(B / 2)
    half = -(-half // 8) * 8     # round up to multiple of 8
    bm = min(1024, B, half)
    bm = max(8, (bm // 8) * 8)   # keep it a multiple of 8
    return bm


@partial(jax.jit, static_argnames=("action_size",))
def policy_forward(state, w_pad, b_pad, action_size):
    """state: (B, S) f32; w_pad: (S, A_PAD) f32; b_pad: (1, A_PAD) f32.

    Returns (B, action_size) f32 logits, identical to torch nn.Linear output.
    The slice to action_size lives inside this jit so it fuses with any
    downstream softmax/argmax/sampling.
    """
    state = state.astype(jnp.float32)
    B, S = state.shape

    if B <= 128:
        # Gridless: single whole-array block, no pipeline machinery.
        out_padded = pl.pallas_call(
            _linear_kernel,
            out_shape=jax.ShapeDtypeStruct((B, A_PAD), jnp.float32),
        )(state, w_pad, b_pad)
    else:
        bm = _pick_batch_block(B)
        grid = (pl.cdiv(B, bm),)

        cost = pl.CostEstimate(
            flops=2 * B * S * A_PAD + B * A_PAD,
            transcendentals=0,
            bytes_accessed=4 * (B * S + S * A_PAD + A_PAD + B * A_PAD),
        )

        out_padded = pl.pallas_call(
            _linear_kernel,
            out_shape=jax.ShapeDtypeStruct((B, A_PAD), jnp.float32),
            grid=grid,
            in_specs=[
                pl.BlockSpec((bm, S), lambda i: (i, 0)),      # x: streams over B
                pl.BlockSpec((S, A_PAD), lambda i: (0, 0)),   # w: resident
                pl.BlockSpec((1, A_PAD), lambda i: (0, 0)),   # b: resident
            ],
            out_specs=pl.BlockSpec((bm, A_PAD), lambda i: (i, 0)),
            compiler_params=pltpu.CompilerParams(
                dimension_semantics=("parallel",),            # >=2 steps -> 2x on v7x
            ),
            cost_estimate=cost,
        )(state, w_pad, b_pad)

    # Drop the zero-padded logit columns; fused by XLA inside this jit.
    return out_padded[:, :action_size]


if __name__ == "__main__":
    # GridWorld-ish sizes: state_size=16, action_size=5 (up/down/left/right/stay)
    state_size = 16
    action_size = 5

    # Deterministic parameter init mirroring the PyTorch __init__:
    #   linear.weight.data.fill_(0.001); linear.bias.data.fill_(1.0)
    weight = jnp.full((action_size, state_size), 0.001, dtype=jnp.float32)
    bias = jnp.full((action_size,), 1.0, dtype=jnp.float32)

    # One-time param prep (transpose + lane-dense zero-pad) — cached, not per call.
    w_pad, b_pad = prepare_policy_params(weight, bias)

    key = jax.random.PRNGKey(0)

    # 1) Toy batch (gridless path).
    batch = 8
    state = jax.random.normal(key, (batch, state_size), dtype=jnp.float32)
    out = jax.block_until_ready(policy_forward(state, w_pad, b_pad, action_size))
    ref = state @ weight.T + bias
    assert out.shape == (batch, action_size)
    assert jnp.allclose(out, ref, atol=1e-5, rtol=1e-5)

    # 2) Larger batch (tiled / parallel-grid path, grid >= 2 steps).
    batch_big = 384
    state_big = jax.random.normal(jax.random.PRNGKey(1),
                                  (batch_big, state_size), dtype=jnp.float32)
    out_big = jax.block_until_ready(
        policy_forward(state_big, w_pad, b_pad, action_size))
    ref_big = state_big @ weight.T + bias
    assert out_big.shape == (batch_big, action_size)
    assert jnp.allclose(out_big, ref_big, atol=1e-5, rtol=1e-5)

    print("KERNEL_OK")
</pallas_src>

<mosaic_0001>
module attributes {stable_mosaic.version = 11 : i64} {
  func.func @_linear_kernel(%arg0: memref<8x16xf32, #tpu.memory_space<vmem>>, %arg1: memref<16x128xf32, #tpu.memory_space<vmem>>, %arg2: memref<1x128xf32, #tpu.memory_space<vmem>>, %arg3: memref<8x128xf32, #tpu.memory_space<vmem>>) attributes {dimension_semantics = [], scalar_prefetch = 0 : i64, scratch_operands = 0 : i64, tpu.core_type = #tpu.core_type<tc>} {
    %c0 = arith.constant 0 : index
    %c0_0 = arith.constant 0 : index
    %0 = vector.load %arg0[%c0, %c0_0] : memref<8x16xf32, #tpu.memory_space<vmem>>, vector<8x16xf32>
    %c0_1 = arith.constant 0 : index
    %c0_2 = arith.constant 0 : index
    %1 = vector.load %arg1[%c0_1, %c0_2] : memref<16x128xf32, #tpu.memory_space<vmem>>, vector<16x128xf32>
    %cst = arith.constant dense<0.000000e+00> : vector<8x128xf32>
    %2 = tpu.matmul %0, %1, %cst {dimension_numbers = #tpu.dot_dimension_numbers<[1], [0], [0], [1], [0, 0, 1, 1], [], []>} : vector<8x16xf32>, vector<16x128xf32>, vector<8x128xf32> -> vector<8x128xf32>
    %c0_3 = arith.constant 0 : index
    %c0_4 = arith.constant 0 : index
    %3 = vector.load %arg2[%c0_3, %c0_4] : memref<1x128xf32, #tpu.memory_space<vmem>>, vector<1x128xf32>
    %4 = vector.broadcast %3 : vector<1x128xf32> to vector<8x128xf32>
    %5 = arith.addf %2, %4 : vector<8x128xf32>
    %c0_5 = arith.constant 0 : index
    %c0_6 = arith.constant 0 : index
    %6 = vector.load %arg3[%c0_5, %c0_6] : memref<8x128xf32, #tpu.memory_space<vmem>>, vector<8x128xf32>
    tpu.vector_store %arg3[%c0_5, %c0_6], %5 {strides = array<i32>} : memref<8x128xf32, #tpu.memory_space<vmem>>, vector<8x128xf32>,
    return
  }
}

</mosaic_0001>

<bundles_post_ra>
// kernel: policy_forward.1
= control target key start
LH: loop header
LB: loop body
LE: loop exit
PB: predicated region body
PF: predicated region fallthrough
CT: control target
= control target key end

     0   :  { %8 = vsyncpa [#allocation3], 0  ;;  %s217_s0 = inlined_call_operand.hbm [shape: f32[8,16], index: 0, kind: input, shape index: {}]   ;;  %s218_s1 = inlined_call_operand.hbm [shape: f32[16,128], index: 1, kind: input, shape index: {}]   ;;  %s219_s2 = inlined_call_operand.vmem [shape: f32[1,128], index: 2, kind: input, shape index: {}]   ;;  %s220_s3 = inlined_call_operand.hbm [shape: f32[8,128], index: 3, kind: output, shape index: {}]  }
   0x1   :  { %9 = vsyncpa [#allocation6], 0 }
   0x2   :  { %10 = vsyncpa [#allocation4], 0  ;;  %s16_s14 = sshll.u32 %s217_s0, 4  ;;  %s180_s15 = smov [#allocation2]   ;;  %s17_s14 = int_to_ptr.hbm [resolvable:$true] %s16_s14 }
   0x3   :  { %s18_s16 = sshll.u32 %s180_s15, 4  ;;  %s26_s19 = sshll.u32 %s218_s1, 4  ;;  %s19_s16 = int_to_ptr.vmem [resolvable:$true] %s18_s16  ;;  %s27_s19 = int_to_ptr.hbm [resolvable:$true] %s26_s19 }
   0x4   :  { %21 = dma.hbm_to_vmem [thread:$0]  %s17_s14, 128, %s19_s16, [#allocation3]  }
   0x5   :  { %s181_s20 = smov [#allocation5]   ;;  %s182_s22 = smov 128  }
   0x6   :  { %s28_s21 = sshll.u32 %s181_s20, 4  ;;  %s183_s23 = smov 8   ;;  %s29_s21 = int_to_ptr.vmem [resolvable:$true] %s28_s21 }
   0x7   :  { %34 = dma.hbm_to_vmem [thread:$0]  %s27_s19, 256, %s29_s21, [#allocation6], %s182_s22, %s182_s22, %s183_s23  }
   0x8   :  { %174 = dma.done.wait [#allocation3], 128  }
   0x9   :  { %175 = vsyncadd [#allocation3], 4294967168 }
   0xa   :  { %176 = dma.done.wait [#allocation6], 256  }
   0xb   :  { %177 = vsyncadd [#allocation6], 4294967040  ;;  %v47_v0 = vld [vmem:[#allocation5 + $0x8] sm:$0xff]  ;;  %v46_v1 = vld [vmem:[#allocation5] sm:$0xff]  ;;  %vm52_vm0 = vcmask 130048   ;;  %s184_s24 = smov [#allocation7]  }
   0xc   :  { %70 = vmatpush.msra.mxu0 %v47_v0  ;;  %v45_v2 = vld [vmem:[#allocation2] sm:$0xff]  ;;  %s82_s25 = sshll.u32 %s184_s24, 4  ;;  %s84_s28 = sshll.u32 %s220_s3, 4  ;;  %s83_s25 = int_to_ptr.vmem [resolvable:$true] %s82_s25  ;;  %s85_s28 = int_to_ptr.hbm [resolvable:$true] %s84_s28 }
   0xd   :  { %v101_v3 = vld [vmem:[%s219_s2] ss:$0 sm:$0xff] }
   0xe   :  { %71 = vmatpush.msra.mxu0 %v46_v1 }
   0xf   :  { %95 = vmatmul.msk.f32.vlgmr.msra.gmra.mxu0 %vm52_vm0, %v45_v2 }
  0x8c   :  { %v73_v4 = vpop.f32.mrf.mxu0 }
  0x8d   :  { %v74_v5 = vadd.f32 %v101_v3, %v73_v4 }
  0x8f   :  { %76 = vst [vmem:[#allocation7] sm:$0xff] %v74_v5 }
  0x90   :  { %87 = dma.vmem_to_hbm [thread:$0]  %s83_s25, 128, %s85_s28, [#allocation4]  }
  0x91   :  { %178 = dma.done.wait [#allocation4], 128  }
  0x92   :  { %179 = vsyncadd [#allocation4], 4294967168 }
  0x93   :  { %92 = vsyncpa [#allocation3], 1 }
  0x94   :  { %93 = vsyncpa [#allocation6], 1 }
  0x95   :  { %94 = vsyncpa [#allocation4], 1 }

</bundles_post_ra>
